<compile_context>
chip_gen: v7x
topology: tpu7x:2x2x1
jax: 0.10.0
libtpu: 0.0.40
codegen_flags: <defaults>
</compile_context>

<pallas_src>
import math
from typing import List

import jax
import jax.numpy as jnp
from jax.experimental import pallas as pl
from jax.experimental.pallas import tpu as pltpu

_LANE = 128      # lane width (last dim)
_SUBLANE = 8     # f32 sublane (second-to-last dim)


def _round_up(x: int, m: int) -> int:
    return ((x + m - 1) // m) * m


def _make_mlp_kernel(num_layers: int, compute_dtype):
    """Kernel body. Ref order: (x, w0, b0, w1, b1, ..., out).

    All layers fused: bf16 matmul (MXU, f32 accumulate) + f32 bias add + f32 tanh.
    Intermediate activations live in vregs/VMEM; weights/biases are grid-resident.
    Only the first out_dim columns of the (lane-padded) final activation are stored.
    """

    def kernel(*refs):
        x_ref = refs[0]
        out_ref = refs[-1]
        param_refs = refs[1:-1]

        h = x_ref[...].astype(compute_dtype)          # (tb, in_dim) -> bf16 once
        for layer in range(num_layers):
            w = param_refs[2 * layer][...]            # (in_p, out_p) compute_dtype
            b = param_refs[2 * layer + 1][...]        # (1, out_p) f32
            h = jnp.dot(h, w, preferred_element_type=jnp.float32) + b
            if layer < num_layers - 1:
                h = jnp.tanh(h).astype(compute_dtype)  # f32 tanh, requantize for next MXU

        out_real = out_ref.shape[-1]                   # real (unpadded) output width
        out_ref[...] = h[:, :out_real].astype(out_ref.dtype)

    return kernel


def mlp_forward(x: jax.Array,
                weights: List[jax.Array],
                biases: List[jax.Array],
                *,
                block_batch: int = 8192,
                compute_dtype=jnp.bfloat16) -> jax.Array:
    """Run the fused MLP Pallas kernel.

    x:        (batch, input_size) float32  (passed to the kernel unpadded)
    weights:  list of (in_i, out_i) float32 (already transposed vs. PyTorch's (out, in))
    biases:   list of (out_i,) float32
    returns:  (batch, out_dim) float32   (out_dim == 1 for this module)
    """
    assert len(weights) == len(biases)
    num_layers = len(weights)
    batch, in_dim = x.shape
    out_dim = weights[-1].shape[1]

    # ---- padded (lane-dense) widths — VMEM/matmul only; HBM I/O keeps real widths ------
    dims_out_p = [_round_up(w.shape[1], _LANE) for w in weights]
    dims_in_p = [in_dim] + dims_out_p[:-1]            # first layer keeps real K=in_dim

    # ---- batch tiling -------------------------------------------------------------------
    # Keep >=2 grid steps for large batches (v7x megacore), tile rounded to the sublane.
    tb = min(block_batch, _round_up(max(pl.cdiv(batch, 2), 1), _SUBLANE))
    tb = max(_SUBLANE, _round_up(tb, _SUBLANE))
    grid = (pl.cdiv(batch, tb),)

    operands = [x]
    in_specs = [pl.BlockSpec((tb, in_dim), lambda i: (i, 0))]

    for li, (w, b) in enumerate(zip(weights, biases)):
        d_in, d_out = w.shape
        d_in_p, d_out_p = dims_in_p[li], dims_out_p[li]

        # Zero padding is exact: padded rows/cols/bias lanes are 0 and tanh(0)=0.
        wp = jnp.zeros((d_in_p, d_out_p), compute_dtype)
        wp = wp.at[:d_in, :d_out].set(w.astype(compute_dtype))
        bp = jnp.zeros((1, d_out_p), jnp.float32)
        bp = bp.at[:, :d_out].set(jnp.reshape(b, (1, -1)).astype(jnp.float32))

        operands += [wp, bp]
        # Constant index_map -> weights & biases stay resident in VMEM across the grid.
        in_specs += [
            pl.BlockSpec((d_in_p, d_out_p), lambda i: (0, 0)),
            pl.BlockSpec((1, d_out_p), lambda i: (0, 0)),
        ]

    out = pl.pallas_call(
        _make_mlp_kernel(num_layers, compute_dtype),
        out_shape=jax.ShapeDtypeStruct((batch, out_dim), jnp.float32),
        grid=grid,
        in_specs=in_specs,
        out_specs=pl.BlockSpec((tb, out_dim), lambda i: (i, 0)),
        compiler_params=pltpu.CompilerParams(
            dimension_semantics=("parallel",),
            vmem_limit_bytes=48 * 1024 * 1024,
        ),
    )(*operands)
    return out


def init_mlp_params(key, input_size: int, hidden_sizes: List[int]):
    """Deterministic init mimicking torch.nn.Linear defaults (U(-1/sqrt(in), 1/sqrt(in)))."""
    dims_in = [input_size] + hidden_sizes
    dims_out = hidden_sizes + [1]
    weights, biases = [], []
    for d_in, d_out in zip(dims_in, dims_out):
        key, kw, kb = jax.random.split(key, 3)
        bound = 1.0 / math.sqrt(d_in)
        # stored as (in, out): transpose of PyTorch's (out, in) weight
        w = jax.random.uniform(kw, (d_in, d_out), jnp.float32, -bound, bound)
        b = jax.random.uniform(kb, (d_out,), jnp.float32, -bound, bound)
        weights.append(w)
        biases.append(b)
    # sigma = ones(1) exists as a parameter in the module but is unused in forward.
    sigma = jnp.ones((1,), jnp.float32)
    return weights, biases, sigma


def mlp_reference_f32(x, weights, biases):
    """Plain-JAX f32 reference of the same forward pass."""
    h = x
    for i, (w, b) in enumerate(zip(weights, biases)):
        h = h @ w + jnp.reshape(b, (1, -1))
        if i < len(weights) - 1:
            h = jnp.tanh(h)
    return h


def mlp_reference_mixed(x, weights, biases, compute_dtype=jnp.bfloat16):
    """Reference mirroring the kernel numerics (bf16 matmul operands, f32 accumulate)."""
    h = x.astype(compute_dtype)
    for i, (w, b) in enumerate(zip(weights, biases)):
        h = jnp.dot(h, w.astype(compute_dtype), preferred_element_type=jnp.float32) \
            + jnp.reshape(b, (1, -1)).astype(jnp.float32)
        if i < len(weights) - 1:
            h = jnp.tanh(h).astype(compute_dtype)
    return h


if __name__ == "__main__":
    key = jax.random.PRNGKey(0)

    # Small, module-consistent shapes: MLP(input_size=32, hidden_sizes=[32, 16])
    input_size = 32
    hidden_sizes = [32, 16]
    batch = 8

    kx, kp = jax.random.split(key)
    x = jax.random.normal(kx, (batch, input_size), jnp.float32)
    weights, biases, sigma = init_mlp_params(kp, input_size, hidden_sizes)

    out = mlp_forward(x, weights, biases)
    out = jax.block_until_ready(out)
    assert out.shape == (batch, 1), out.shape

    # Numerics check against a reference using the same mixed-precision scheme.
    ref_mixed = mlp_reference_mixed(x, weights, biases)
    assert jnp.allclose(out, ref_mixed, atol=1e-4, rtol=1e-4), (out, ref_mixed)

    # Looser semantic check against the pure-f32 reference (bf16 matmul rounding only).
    ref_f32 = mlp_reference_f32(x, weights, biases)
    assert jnp.allclose(out, ref_f32, atol=3e-2, rtol=3e-2), (out, ref_f32)

    # Exercise the partial-block path (batch not a multiple of the batch tile): the
    # trailing OOB rows of the last block are masked on writeback, so results must match.
    batch2 = 13
    x2 = jax.random.normal(jax.random.PRNGKey(1), (batch2, input_size), jnp.float32)
    out2 = jax.block_until_ready(mlp_forward(x2, weights, biases))
    ref2 = mlp_reference_mixed(x2, weights, biases)
    assert out2.shape == (batch2, 1), out2.shape
    assert jnp.allclose(out2, ref2, atol=1e-4, rtol=1e-4), (out2, ref2)

    print("KERNEL_OK")
</pallas_src>

<mosaic_0001>
module attributes {stable_mosaic.version = 11 : i64} {
  func.func @kernel(%arg0: i32, %arg1: memref<8x32xf32, #tpu.memory_space<vmem>>, %arg2: memref<32x128xbf16, #tpu.memory_space<vmem>>, %arg3: memref<1x128xf32, #tpu.memory_space<vmem>>, %arg4: memref<128x128xbf16, #tpu.memory_space<vmem>>, %arg5: memref<1x128xf32, #tpu.memory_space<vmem>>, %arg6: memref<128x128xbf16, #tpu.memory_space<vmem>>, %arg7: memref<1x128xf32, #tpu.memory_space<vmem>>, %arg8: memref<8x1xf32, #tpu.memory_space<vmem>>) attributes {dimension_semantics = [#tpu.dimension_semantics<parallel>], iteration_bounds = array<i64: 1>, scalar_prefetch = 0 : i64, scratch_operands = 0 : i64, tpu.core_type = #tpu.core_type<tc>, window_params = [{transform_indices = @transform_0, window_bounds = array<i64: 8, 32>}, {pipeline_mode = #tpu.pipeline_mode<synchronous>, transform_indices = @transform_1, window_bounds = array<i64: 32, 128>}, {pipeline_mode = #tpu.pipeline_mode<synchronous>, transform_indices = @transform_2, window_bounds = array<i64: 1, 128>}, {pipeline_mode = #tpu.pipeline_mode<synchronous>, transform_indices = @transform_3, window_bounds = array<i64: 128, 128>}, {pipeline_mode = #tpu.pipeline_mode<synchronous>, transform_indices = @transform_4, window_bounds = array<i64: 1, 128>}, {pipeline_mode = #tpu.pipeline_mode<synchronous>, transform_indices = @transform_5, window_bounds = array<i64: 128, 128>}, {pipeline_mode = #tpu.pipeline_mode<synchronous>, transform_indices = @transform_6, window_bounds = array<i64: 1, 128>}, {transform_indices = @transform_7, window_bounds = array<i64: 8, 1>}]} {
    %c0 = arith.constant 0 : index
    %c0_0 = arith.constant 0 : index
    %0 = vector.load %arg1[%c0, %c0_0] : memref<8x32xf32, #tpu.memory_space<vmem>>, vector<8x32xf32>
    %1 = arith.truncf %0 : vector<8x32xf32> to vector<8x32xbf16>
    %c0_1 = arith.constant 0 : index
    %c0_2 = arith.constant 0 : index
    %2 = vector.load %arg2[%c0_1, %c0_2] : memref<32x128xbf16, #tpu.memory_space<vmem>>, vector<32x128xbf16>
    %c0_3 = arith.constant 0 : index
    %c0_4 = arith.constant 0 : index
    %3 = vector.load %arg3[%c0_3, %c0_4] : memref<1x128xf32, #tpu.memory_space<vmem>>, vector<1x128xf32>
    %cst = arith.constant dense<0.000000e+00> : vector<8x128xf32>
    %4 = tpu.matmul %1, %2, %cst {dimension_numbers = #tpu.dot_dimension_numbers<[1], [0], [0], [1], [0, 0, 1, 1], [], []>} : vector<8x32xbf16>, vector<32x128xbf16>, vector<8x128xf32> -> vector<8x128xf32>
    %5 = vector.broadcast %3 : vector<1x128xf32> to vector<8x128xf32>
    %6 = arith.addf %4, %5 : vector<8x128xf32>
    %7 = math.tanh %6 : vector<8x128xf32>
    %8 = arith.truncf %7 : vector<8x128xf32> to vector<8x128xbf16>
    %c0_5 = arith.constant 0 : index
    %c0_6 = arith.constant 0 : index
    %9 = vector.load %arg4[%c0_5, %c0_6] : memref<128x128xbf16, #tpu.memory_space<vmem>>, vector<128x128xbf16>
    %c0_7 = arith.constant 0 : index
    %c0_8 = arith.constant 0 : index
    %10 = vector.load %arg5[%c0_7, %c0_8] : memref<1x128xf32, #tpu.memory_space<vmem>>, vector<1x128xf32>
    %cst_9 = arith.constant dense<0.000000e+00> : vector<8x128xf32>
    %11 = tpu.matmul %8, %9, %cst_9 {dimension_numbers = #tpu.dot_dimension_numbers<[1], [0], [0], [1], [0, 0, 1, 1], [], []>} : vector<8x128xbf16>, vector<128x128xbf16>, vector<8x128xf32> -> vector<8x128xf32>
    %12 = vector.broadcast %10 : vector<1x128xf32> to vector<8x128xf32>
    %13 = arith.addf %11, %12 : vector<8x128xf32>
    %14 = math.tanh %13 : vector<8x128xf32>
    %15 = arith.truncf %14 : vector<8x128xf32> to vector<8x128xbf16>
    %c0_10 = arith.constant 0 : index
    %c0_11 = arith.constant 0 : index
    %16 = vector.load %arg6[%c0_10, %c0_11] : memref<128x128xbf16, #tpu.memory_space<vmem>>, vector<128x128xbf16>
    %c0_12 = arith.constant 0 : index
    %c0_13 = arith.constant 0 : index
    %17 = vector.load %arg7[%c0_12, %c0_13] : memref<1x128xf32, #tpu.memory_space<vmem>>, vector<1x128xf32>
    %cst_14 = arith.constant dense<0.000000e+00> : vector<8x128xf32>
    %18 = tpu.matmul %15, %16, %cst_14 {dimension_numbers = #tpu.dot_dimension_numbers<[1], [0], [0], [1], [0, 0, 1, 1], [], []>} : vector<8x128xbf16>, vector<128x128xbf16>, vector<8x128xf32> -> vector<8x128xf32>
    %19 = vector.broadcast %17 : vector<1x128xf32> to vector<8x128xf32>
    %20 = arith.addf %18, %19 : vector<8x128xf32>
    %21 = vector.extract_strided_slice %20 {offsets = [0, 0], sizes = [8, 1], strides = [1, 1]} : vector<8x128xf32> to vector<8x1xf32>
    %c0_15 = arith.constant 0 : index
    %c0_16 = arith.constant 0 : index
    %22 = vector.load %arg8[%c0_15, %c0_16] : memref<8x1xf32, #tpu.memory_space<vmem>>, vector<8x1xf32>
    tpu.vector_store %arg8[%c0_15, %c0_16], %21 {strides = array<i32>} : memref<8x1xf32, #tpu.memory_space<vmem>>, vector<8x1xf32>,
    return
  }
  func.func @transform_0(%arg0: i32) -> (i32, i32) {
    %c0_i32 = arith.constant 0 : i32
    %c0_i32_0 = arith.constant 0 : i32
    return %arg0, %c0_i32 : i32, i32
  }
  func.func @transform_1(%arg0: i32) -> (i32, i32) {
    %c0_i32 = arith.constant 0 : i32
    %c0_i32_0 = arith.constant 0 : i32
    %c0_i32_1 = arith.constant 0 : i32
    return %c0_i32, %c0_i32_0 : i32, i32
  }
  func.func @transform_2(%arg0: i32) -> (i32, i32) {
    %c0_i32 = arith.constant 0 : i32
    %c0_i32_0 = arith.constant 0 : i32
    %c0_i32_1 = arith.constant 0 : i32
    return %c0_i32, %c0_i32_0 : i32, i32
  }
  func.func @transform_3(%arg0: i32) -> (i32, i32) {
    %c0_i32 = arith.constant 0 : i32
    %c0_i32_0 = arith.constant 0 : i32
    %c0_i32_1 = arith.constant 0 : i32
    return %c0_i32, %c0_i32_0 : i32, i32
  }
  func.func @transform_4(%arg0: i32) -> (i32, i32) {
    %c0_i32 = arith.constant 0 : i32
    %c0_i32_0 = arith.constant 0 : i32
    %c0_i32_1 = arith.constant 0 : i32
    return %c0_i32, %c0_i32_0 : i32, i32
  }
  func.func @transform_5(%arg0: i32) -> (i32, i32) {
    %c0_i32 = arith.constant 0 : i32
    %c0_i32_0 = arith.constant 0 : i32
    %c0_i32_1 = arith.constant 0 : i32
    return %c0_i32, %c0_i32_0 : i32, i32
  }
  func.func @transform_6(%arg0: i32) -> (i32, i32) {
    %c0_i32 = arith.constant 0 : i32
    %c0_i32_0 = arith.constant 0 : i32
    %c0_i32_1 = arith.constant 0 : i32
    return %c0_i32, %c0_i32_0 : i32, i32
  }
  func.func @transform_7(%arg0: i32) -> (i32, i32) {
    %c0_i32 = arith.constant 0 : i32
    %c0_i32_0 = arith.constant 0 : i32
    return %arg0, %c0_i32 : i32, i32
  }
}

</mosaic_0001>

<bundles_post_ra>
// kernel: tpu_custom_call.1
= control target key start
LH: loop header
LB: loop body
LE: loop exit
PB: predicated region body
PF: predicated region fallthrough
CT: control target
= control target key end

     0   :  { %12 = vsyncpa [#allocation3], 0  ;;  %s740_s0 = inlined_call_operand.hbm [shape: f32[8,32], index: 0, kind: input, shape index: {}]   ;;  %s741_s1 = inlined_call_operand.hbm [shape: bf16[32,128], index: 1, kind: input, shape index: {}]   ;;  %s742_s2 = inlined_call_operand.vmem [shape: f32[1,128], index: 2, kind: input, shape index: {}]   ;;  %s743_s3 = inlined_call_operand.hbm [shape: bf16[128,128], index: 3, kind: input, shape index: {}]   ;;  %s744_s4 = inlined_call_operand.vmem [shape: f32[1,128], index: 4, kind: input, shape index: {}]   ;;  %s745_s5 = inlined_call_operand.hbm [shape: bf16[128,128], index: 5, kind: input, shape index: {}]   ;;  %s746_s6 = inlined_call_operand.vmem [shape: f32[1,128], index: 6, kind: input, shape index: {}]   ;;  %s747_s7 = inlined_call_operand.vmem [shape: f32[8,1], index: 7, kind: output, shape index: {}]  }
   0x1   :  { %13 = vsyncpa [#allocation5], 0 }
   0x2   :  { %14 = vsyncpa [#allocation8], 0  ;;  %s599_s24 = smov [#allocation4]   ;;  %s505_s28 = scalar_lea.hbm %s741_s1, 256 }
   0x3   :  { %s30_s25 = sshll.u32 %s599_s24, 4  ;;  %p506_p0 = scmp.ne.s32.totalorder %s741_s1, %s505_s28  ;;  %s31_s25 = int_to_ptr.vmem [resolvable:$true] %s30_s25 }
   0x4   :  { %p509_p1 = scmp.lt.u32.totalorder %s505_s28, %s741_s1 }
   0x6   :  { %p511_p2 = pnand %p509_p1, %p506_p0 }
   0x8   :  { %514 = shalt.err (!%p511_p2)
}
   0x9   :  { %s515_s10 = scalar_lea.vmem %s31_s25, 256  ;;  %p520_p4 = scmp.lt.s32.totalorder %s31_s25, %s31_s25 }
   0xa   :  { %p516_p3 = scmp.ne.s32.totalorder %s31_s25, %s515_s10  ;;  %p521_p5 = scmp.lt.s32.totalorder %s515_s10, %s515_s10 }
   0xc   :  { %p522_p6 = por %p521_p5, %p520_p4 }
   0xe   :  { %p523_p7 = pnand %p522_p6, %p516_p3 }
  0x10   :  { %526 = shalt.err (!%p523_p7)
}
  0x11   :  { %s600_s11 = smov 64   ;;  %s601_s12 = smov 4  }
  0x12   :  { %36 = dma.hbm_to_vmem [thread:$0]  %s741_s1, 256, %s31_s25, [#allocation5], %s600_s11, %s600_s11, %s601_s12  }
  0x13   :  { %s602_s15 = smov [#allocation2]   ;;  %s603_s17 = smov [#allocation6]  }
  0x14   :  { %s21_s16 = sshll.u32 %s602_s15, 4  ;;  %s44_s18 = sshll.u32 %s603_s17, 4  ;;  %s22_s16 = int_to_ptr.vmem [resolvable:$true] %s21_s16  ;;  %s45_s18 = int_to_ptr.vmem [resolvable:$true] %s44_s18 }
  0x15   :  { %s527_s21 = scalar_lea.hbm %s740_s0, 128 }
  0x16   :  { %p528_p8 = scmp.ne.s32.totalorder %s740_s0, %s527_s21  ;;  %p531_p9 = scmp.lt.u32.totalorder %s527_s21, %s740_s0 }
  0x18   :  { %p533_p10 = pnand %p531_p9, %p528_p8 }
  0x1a   :  { %536 = shalt.err (!%p533_p10)
}
  0x1b   :  { %s537_s1 = scalar_lea.vmem %s22_s16, 128  ;;  %p542_p12 = scmp.lt.s32.totalorder %s22_s16, %s22_s16 }
  0x1c   :  { %p538_p11 = scmp.ne.s32.totalorder %s22_s16, %s537_s1  ;;  %p543_p13 = scmp.lt.s32.totalorder %s537_s1, %s537_s1 }
  0x1e   :  { %p544_p0 = por %p543_p13, %p542_p12 }
  0x20   :  { %p545_p1 = pnand %p544_p0, %p538_p11 }
  0x22   :  { %548 = shalt.err (!%p545_p1)
}
  0x23   :  { %24 = dma.hbm_to_vmem [thread:$0]  %s740_s0, 128, %s22_s16, [#allocation3]  }
  0x24   :  { %s549_s30 = scalar_lea.hbm %s743_s3, 1024 }
  0x25   :  { %p550_p2 = scmp.ne.s32.totalorder %s743_s3, %s549_s30  ;;  %p553_p3 = scmp.lt.u32.totalorder %s549_s30, %s743_s3 }
  0x27   :  { %p555_p4 = pnand %p553_p3, %p550_p2 }
  0x29   :  { %558 = shalt.err (!%p555_p4)
}
  0x2a   :  { %s559_s14 = scalar_lea.vmem %s45_s18, 1024  ;;  %p564_p6 = scmp.lt.s32.totalorder %s45_s18, %s45_s18 }
  0x2b   :  { %p560_p5 = scmp.ne.s32.totalorder %s45_s18, %s559_s14  ;;  %p565_p7 = scmp.lt.s32.totalorder %s559_s14, %s559_s14 }
  0x2d   :  { %p566_p8 = por %p565_p7, %p564_p6 }
  0x2f   :  { %p567_p9 = pnand %p566_p8, %p560_p5 }
  0x31   :  { %570 = shalt.err (!%p567_p9)
}
  0x32   :  { %50 = dma.hbm_to_vmem [thread:$0]  %s743_s3, 1024, %s45_s18, [#allocation5], %s600_s11, %s600_s11, %s601_s12  }
  0x33   :  { %s604_s16 = smov [#allocation7]   ;;  %s571_s21 = scalar_lea.hbm %s745_s5, 1024 }
  0x34   :  { %s58_s17 = sshll.u32 %s604_s16, 4  ;;  %p572_p10 = scmp.ne.s32.totalorder %s745_s5, %s571_s21  ;;  %s59_s17 = int_to_ptr.vmem [resolvable:$true] %s58_s17 }
  0x35   :  { %p575_p11 = scmp.lt.u32.totalorder %s571_s21, %s745_s5 }
  0x37   :  { %p577_p12 = pnand %p575_p11, %p572_p10 }
  0x39   :  { %580 = shalt.err (!%p577_p12)
}
  0x3a   :  { %s581_s1 = scalar_lea.vmem %s59_s17, 1024  ;;  %p586_p0 = scmp.lt.s32.totalorder %s59_s17, %s59_s17 }
  0x3b   :  { %p582_p13 = scmp.ne.s32.totalorder %s59_s17, %s581_s1  ;;  %p587_p1 = scmp.lt.s32.totalorder %s581_s1, %s581_s1 }
  0x3d   :  { %p588_p2 = por %p587_p1, %p586_p0 }
  0x3f   :  { %p589_p3 = pnand %p588_p2, %p582_p13 }
  0x41   :  { %592 = shalt.err (!%p589_p3)
}
  0x42   :  { %64 = dma.hbm_to_vmem [thread:$0]  %s745_s5, 1024, %s59_s17, [#allocation8], %s600_s11, %s600_s11, %s601_s12  }
  0x43   :  { %593 = dma.done.wait [#allocation3], 128  }
  0x44   :  { %594 = vsyncadd [#allocation3], 4294967168 }
  0x45   :  { %595 = dma.done.wait [#allocation5], 1280  }
  0x46   :  { %596 = vsyncadd [#allocation5], 4294966016 }
  0x47   :  { %597 = dma.done.wait [#allocation8], 1024  }
  0x48   :  { %598 = vsyncadd [#allocation8], 4294966272  ;;  %v605_v0 = vmov 0.0   ;;  %vm606_vm0 = vmmov 0   ;;  %v483_v1 = vld [vmem:[#allocation4] sm:$0xff]   ;;  %v484_v2 = vld [vmem:[#allocation4 + $0x8] sm:$0xff]  }
  0x49   :  { %427 = vmatprep.subr.bf16.mxu0 %v605_v0  ;;  %431 = vmatprep.mubr.msk.bf16.mxu0 %vm606_vm0, %v605_v0  ;;  %v80_v3 = vld [vmem:[#allocation2] sm:$0xff]  ;;  %v485_v4 = vld [vmem:[#allocation6] sm:$0xff]   ;;  %vm105_vm1 = vcmask 261120   ;;  %v487_v7 = vld [vmem:[#allocation6 + $0x10] sm:$0xff]   ;;  %vm375_vm2 = vcmask 7168  }
  0x4a   :  { %435 = vmatprep.subr.bf16.mxu1 %v605_v0  ;;  %451 = vmatprep.mubr.msk.bf16.mxu1 %vm606_vm0, %v605_v0  ;;  %v81_v5 = vpack.c.bf16 %v80_v3, %v80_v3  ;;  %v486_v6 = vld [vmem:[#allocation6 + $0x8] sm:$0xff]   ;;  %v488_v8 = vld [vmem:[#allocation6 + $0x18] sm:$0xff]   ;;  %v489_v9 = vld [vmem:[#allocation6 + $0x20] sm:$0xff]  }
  0x4b   :  { %428 = vmatpush3.bf16.msra.mxu0 %v483_v1  ;;  %436 = vmatpush3.bf16.msra.mxu1 %v485_v4  ;;  %v490_v10 = vld [vmem:[#allocation6 + $0x28] sm:$0xff]   ;;  %v491_v11 = vld [vmem:[#allocation6 + $0x30] sm:$0xff]   ;;  %v492_v12 = vld [vmem:[#allocation6 + $0x38] sm:$0xff]  }
  0x4c   :  { %429 = vmatprep.subr.bf16.mxu0 %v605_v0  ;;  %437 = vmatprep.subr.bf16.mxu1 %v605_v0  ;;  %v493_v13 = vld [vmem:[#allocation7] sm:$0xff]   ;;  %v494_v14 = vld [vmem:[#allocation7 + $0x8] sm:$0xff]   ;;  %v495_v15 = vld [vmem:[#allocation7 + $0x10] sm:$0xff]  }
  0x4d   :  { %v496_v16 = vld [vmem:[#allocation7 + $0x18] sm:$0xff]   ;;  %v384_v17 = vld [vmem:[%s742_s2] ss:$0 sm:$0xff]  ;;  %v497_v25 = vld [vmem:[#allocation7 + $0x20] sm:$0xff]  }
  0x4e   :  { %v498_v26 = vld [vmem:[#allocation7 + $0x28] sm:$0xff]   ;;  %v499_v27 = vld [vmem:[#allocation7 + $0x30] sm:$0xff]   ;;  %v500_v28 = vld [vmem:[#allocation7 + $0x38] sm:$0xff]  }
  0x4f   :  { %430 = vmatpush3.bf16.msra.mxu0 %v484_v2  ;;  %438 = vmatpush3.bf16.msra.mxu1 %v486_v6  ;;  %v388_v29 = vld [vmem:[%s744_s4] ss:$0 sm:$0xff] }
  0x50   :  { %455 = vmatprep.subr.bf16.mxu0 %v605_v0  ;;  %439 = vmatprep.subr.bf16.mxu1 %v605_v0  ;;  %v397_v37 = vld [vmem:[%s746_s6] ss:$0 sm:$0xff] }
  0x52   :  { %432 = vmatmul.mubr.msk.bf16.vlgmr.msra.gmra.mrb[0].mxu0 %vm105_vm1, %v81_v5 }
  0x53   :  { %471 = vmatprep.mubr.msk.bf16.mxu0 %vm606_vm0, %v605_v0  ;;  %440 = vmatpush3.bf16.msra.mxu1 %v487_v7 }
  0x54   :  { %441 = vmatprep.subr.bf16.mxu1 %v605_v0  ;;  %456 = vmatpush3.bf16.msra.mxu0 %v493_v13 }
  0x55   :  { %457 = vmatprep.subr.bf16.mxu0 %v605_v0 }
  0x57   :  { %442 = vmatpush3.bf16.msra.mxu1 %v488_v8 }
  0x58   :  { %443 = vmatprep.subr.bf16.mxu1 %v605_v0  ;;  %458 = vmatpush3.bf16.msra.mxu0 %v494_v14 }
  0x59   :  { %459 = vmatprep.subr.bf16.mxu0 %v605_v0 }
  0x5b   :  { %444 = vmatpush3.bf16.msra.mxu1 %v489_v9 }
  0x5c   :  { %445 = vmatprep.subr.bf16.mxu1 %v605_v0  ;;  %460 = vmatpush3.bf16.msra.mxu0 %v495_v15 }
  0x5d   :  { %461 = vmatprep.subr.bf16.mxu0 %v605_v0 }
  0x5f   :  { %446 = vmatpush3.bf16.msra.mxu1 %v490_v10 }
  0x60   :  { %447 = vmatprep.subr.bf16.mxu1 %v605_v0  ;;  %462 = vmatpush3.bf16.msra.mxu0 %v496_v16 }
  0x61   :  { %463 = vmatprep.subr.bf16.mxu0 %v605_v0 }
  0x63   :  { %448 = vmatpush3.bf16.msra.mxu1 %v491_v11 }
  0x64   :  { %449 = vmatprep.subr.bf16.mxu1 %v605_v0  ;;  %464 = vmatpush3.bf16.msra.mxu0 %v497_v25 }
  0x65   :  { %465 = vmatprep.subr.bf16.mxu0 %v605_v0 }
  0x67   :  { %450 = vmatpush3.bf16.msra.mxu1 %v492_v12 }
  0x68   :  { %466 = vmatpush3.bf16.msra.mxu0 %v498_v26 }
  0x69   :  { %467 = vmatprep.subr.bf16.mxu0 %v605_v0 }
  0x6c   :  { %468 = vmatpush3.bf16.msra.mxu0 %v499_v27 }
  0x6d   :  { %469 = vmatprep.subr.bf16.mxu0 %v605_v0 }
  0x70   :  { %470 = vmatpush3.bf16.msra.mxu0 %v500_v28 }
 0x125   :  { %v143_v18 = vpop.f32.mrb[0].mxu0 }
 0x126   :  { %v144_v19 = vadd.f32 %v384_v17, %v143_v18  ;;  %v433_v20 = vpop.f32.mrb[1].mxu0 }
 0x127   :  { %v146_v21 = vpop.f32.mrb[2].mxu0 }
 0x128   :  { %501 = vtanh.f32 %v144_v19  ;;  %v434_v22 = vpop.f32.mrb[3].mxu0 }
 0x132   :  { %v502_v23 = vpop.eup %501 }
 0x133   :  { %v150_v24 = vpack.c.bf16 %v502_v23, %v502_v23 }
 0x135   :  { %452 = vmatmul.mubr.bf16.vlgmr.msra.gmra.mrb[0].mxu1 %v150_v24 }
 0x208   :  { %v256_v30 = vpop.f32.mrb[0].mxu1 }
 0x209   :  { %v257_v31 = vadd.f32 %v388_v29, %v256_v30  ;;  %v453_v32 = vpop.f32.mrb[1].mxu1 }
 0x20a   :  { %v259_v33 = vpop.f32.mrb[2].mxu1 }
 0x20b   :  { %503 = vtanh.f32 %v257_v31  ;;  %v454_v34 = vpop.f32.mrb[3].mxu1 }
 0x215   :  { %v504_v35 = vpop.eup %503 }
 0x216   :  { %v263_v36 = vpack.c.bf16 %v504_v35, %v504_v35 }
 0x218   :  { %472 = vmatmul.mubr.bf16.vlgmr.msra.gmra.mrb[4].mxu0 %v263_v36 }
 0x2eb   :  { %v369_v38 = vpop.f32.mrb[4].mxu0 }
 0x2ec   :  { %v370_v39 = vadd.f32 %v397_v37, %v369_v38  ;;  %v473_v40 = vpop.f32.mrb[5].mxu0 }
 0x2ed   :  { %v372_v41 = vpop.f32.mrb[6].mxu0 }
 0x2ee   :  { %376 = vst.msk [vmem:[%s747_s7] sm:$0xff] %vm375_vm2, %v370_v39  ;;  %v474_v42 = vpop.f32.mrb[7].mxu0 }
 0x2ef   :  { %381 = vsyncpa [#allocation3], 1 }
 0x2f0   :  { %382 = vsyncpa [#allocation5], 1 }
 0x2f1   :  { %383 = vsyncpa [#allocation8], 1 }

</bundles_post_ra>
